<compile_context>
chip_gen: v7x
topology: tpu7x:2x2x1
jax: 0.10.0
libtpu: 0.0.40
codegen_flags: <defaults>
</compile_context>

<pallas_src>
import jax
import jax.numpy as jnp
from jax.experimental import pallas as pl
from jax.experimental.pallas import tpu as pltpu


def _round_up(x: int, m: int) -> int:
    return (x + m - 1) // m * m


def _pick_divisor_tile(dim: int, target: int, quantum: int) -> int:
    """Largest multiple of `quantum` that divides `dim` and is <= target.

    `dim` must itself be a multiple of `quantum` (guaranteed by the one-time
    parameter padding), so the loop always terminates at `quantum`.
    """
    t = max(quantum, (min(target, dim) // quantum) * quantum)
    while dim % t:
        t -= quantum
    return t


# Raised scoped-VMEM budget: above v5e's 16 MiB / v6e-v7x's 32 MiB defaults,
# but leaves headroom under v7x's 64 MiB/TC physical VMEM.
_VMEM_LIMIT_BYTES = 48 * 1024 * 1024
# Threshold for keeping the whole bf16 weight resident in VMEM (fits all
# generations, incl. v7x, alongside double-buffered x/out tiles).
_W_RESIDENT_LIMIT_BYTES = 8 * 1024 * 1024


# ----------------------------------------------------------------------------
# Kernel 1: W-resident path.  Grid = (M tiles,); W/b are constant-index
# full-array blocks (DMA'd once).  x arrives f32 and is cast to bf16 in-kernel.
#   x_ref: (tm, Kp) f32   w_ref: (Kp, Np) bf16   b_ref: (1, Np) f32
#   o_ref: (tm, Np) out_dtype
# ----------------------------------------------------------------------------
def _linear_resident_kernel(x_ref, w_ref, b_ref, o_ref):
    x = x_ref[...].astype(w_ref.dtype)  # in-register cast, no extra HBM pass
    y = jnp.dot(x, w_ref[...], preferred_element_type=jnp.float32)
    o_ref[...] = (y + b_ref[...]).astype(o_ref.dtype)


# ----------------------------------------------------------------------------
# Kernel 2: K-tiled path for large hidden sizes.  Grid = (M, N, K-last).
# Accumulates directly into the resident f32 output block (no VMEM scratch);
# bias is folded into the first K step.
#   x_ref: (tm, tk) f32   w_ref: (tk, tn) bf16   b_ref: (1, tn) f32
#   o_ref: (tm, tn) f32
# ----------------------------------------------------------------------------
def _linear_ktiled_kernel(x_ref, w_ref, b_ref, o_ref):
    k = pl.program_id(2)
    x = x_ref[...].astype(w_ref.dtype)
    part = jnp.dot(x, w_ref[...], preferred_element_type=jnp.float32)

    @pl.when(k == 0)
    def _init():
        o_ref[...] = part + b_ref[...]

    @pl.when(k > 0)
    def _accum():
        o_ref[...] += part


def pallas_linear(x2d, w_padded, b_padded, out_features, *, tm=512, tn=512, tk=1024):
    """y = x2d @ W + b with one-time-prepped, lane-aligned parameters.

    x2d:      (M, K) f32 (cast to bf16 inside the kernel)
    w_padded: (Kp, Np) bf16, Kp/Np multiples of 128, padded once at init
    b_padded: (1, Np) f32, padded once at init
    Returns (M, out_features) in x2d.dtype.
    """
    M, K = x2d.shape
    Kp, Np = w_padded.shape
    N = out_features
    out_dtype = x2d.dtype

    if Kp != K:
        # Rare: hidden size not already a multiple of 128 (params were padded
        # once at init; x needs a matching zero-pad on K).
        x2d = jnp.pad(x2d, ((0, 0), (0, Kp - K)))

    w_bytes = Kp * Np * w_padded.dtype.itemsize

    if w_bytes <= _W_RESIDENT_LIMIT_BYTES:
        # ---------------- W-resident path ----------------
        tm_a = min(tm, _round_up(M, 16))
        # v7x: make sure both TensorCores get work when M allows >=2 tiles.
        if M >= 32 and _round_up(M, tm_a) // tm_a < 2:
            tm_a = _round_up((M + 1) // 2, 16)
        Mp = _round_up(M, tm_a)
        xp = x2d if Mp == M else jnp.pad(x2d, ((0, Mp - M), (0, 0)))
        grid_m = Mp // tm_a

        out = pl.pallas_call(
            _linear_resident_kernel,
            out_shape=jax.ShapeDtypeStruct((Mp, Np), out_dtype),
            grid_spec=pltpu.PrefetchScalarGridSpec(
                num_scalar_prefetch=0,
                grid=(grid_m,),
                in_specs=[
                    pl.BlockSpec((tm_a, Kp), lambda i: (i, 0)),
                    pl.BlockSpec((Kp, Np), lambda i: (0, 0)),  # resident W
                    pl.BlockSpec((1, Np), lambda i: (0, 0)),   # resident bias
                ],
                out_specs=pl.BlockSpec((tm_a, Np), lambda i: (i, 0)),
            ),
            compiler_params=pltpu.CompilerParams(
                dimension_semantics=("parallel",),
                vmem_limit_bytes=_VMEM_LIMIT_BYTES,
            ),
            cost_estimate=pl.CostEstimate(
                flops=2 * Mp * Kp * Np,
                transcendentals=0,
                bytes_accessed=Mp * Kp * 4 + Kp * Np * 2 + Np * 4 + Mp * Np * 4,
            ),
        )(xp, w_padded, b_padded)

        if Mp != M or Np != N:
            out = out[:M, :N]
        return out

    # ---------------- K-tiled path (large hidden) ----------------
    tm_b = min(tm, _round_up(M, 16))
    tn_b = _pick_divisor_tile(Np, tn, 128)
    tk_b = _pick_divisor_tile(Kp, tk, 128)
    Mp = _round_up(M, tm_b)
    xp = x2d if Mp == M else jnp.pad(x2d, ((0, Mp - M), (0, 0)))
    grid = (Mp // tm_b, Np // tn_b, Kp // tk_b)

    out = pl.pallas_call(
        _linear_ktiled_kernel,
        out_shape=jax.ShapeDtypeStruct((Mp, Np), jnp.float32),
        grid_spec=pltpu.PrefetchScalarGridSpec(
            num_scalar_prefetch=0,
            grid=grid,
            in_specs=[
                pl.BlockSpec((tm_b, tk_b), lambda i, j, k: (i, k)),
                pl.BlockSpec((tk_b, tn_b), lambda i, j, k: (k, j)),
                pl.BlockSpec((1, tn_b), lambda i, j, k: (0, j)),
            ],
            out_specs=pl.BlockSpec((tm_b, tn_b), lambda i, j, k: (i, j)),
        ),
        compiler_params=pltpu.CompilerParams(
            dimension_semantics=("parallel", "parallel", "arbitrary"),
            vmem_limit_bytes=_VMEM_LIMIT_BYTES,
        ),
        cost_estimate=pl.CostEstimate(
            flops=2 * Mp * Kp * Np,
            transcendentals=0,
            bytes_accessed=(Np // tn_b) * Mp * Kp * 4
            + (Mp // tm_b) * Kp * Np * 2
            + Mp * Np * 4,
        ),
    )(xp, w_padded, b_padded)

    out = out[:M, :N] if (Mp != M or Np != N) else out
    if out.dtype != out_dtype:
        out = out.astype(out_dtype)
    return out


# ----------------------------------------------------------------------------
# The wrapped inner module (analogue of nn.Linear(H, H)); its forward runs the
# Pallas kernel above.  Parameter padding/casting happens exactly once here.
# ----------------------------------------------------------------------------
class InnerLinear:
    def __init__(self, hidden, key, compute_dtype=jnp.bfloat16):
        k_w, k_b = jax.random.split(key)
        self.hidden = hidden
        # Deterministic synthetic parameters (no checkpoint loading).
        self.w = jax.random.normal(k_w, (hidden, hidden), jnp.float32) * 0.02
        self.b = jax.random.normal(k_b, (hidden,), jnp.float32) * 0.01

        # One-time parameter prep: lane-align (multiples of 128) and cast W to
        # the MXU compute dtype here, not on every forward.
        Kp = _round_up(hidden, 128)
        Np = _round_up(hidden, 128)
        self.w_padded = jnp.pad(
            self.w, ((0, Kp - hidden), (0, Np - hidden))
        ).astype(compute_dtype)
        self.b_padded = (
            jnp.pad(self.b, (0, Np - hidden)).reshape(1, Np).astype(jnp.float32)
        )

    def __call__(self, x):
        # x: (B, S, H) -> flatten leading dims so the matmul sees a tall M,
        # run the Pallas linear, restore the original shape.
        B, S, H = x.shape
        y2d = pallas_linear(
            x.reshape(B * S, H), self.w_padded, self.b_padded, out_features=H
        )
        return y2d.reshape(B, S, H)


# ----------------------------------------------------------------------------
# DummyWrapper: identical semantics to the PyTorch class — pure delegation.
# ----------------------------------------------------------------------------
class DummyWrapper:
    """Wrapper class for a single module, which does nothing (pass-through)."""

    def __init__(self, module):
        self.module = module

    def __call__(self, *args, **kwargs):
        return self.module(*args, **kwargs)

    # alias to match nn.Module.forward naming
    forward = __call__


if __name__ == "__main__":
    # Small but lane-dense shapes: hidden=128 keeps the last dim a full lane
    # width (unmasked stores, full MXU columns) while staying tiny.  This hits
    # the W-resident fast path (whole bf16 W lives in VMEM).
    B, S, H = 2, 8, 128

    key = jax.random.PRNGKey(0)
    k_x, k_params = jax.random.split(key)
    x = jax.random.normal(k_x, (B, S, H), jnp.float32)

    inner = InnerLinear(H, k_params)
    wrapper = DummyWrapper(inner)

    out = jax.block_until_ready(wrapper(x))

    # Reference follows the same numeric path (bf16 operands, f32 accumulate).
    xb = x.reshape(B * S, H).astype(jnp.bfloat16).astype(jnp.float32)
    wb = inner.w.astype(jnp.bfloat16).astype(jnp.float32)
    ref = (xb @ wb + inner.b).reshape(B, S, H)

    assert out.shape == (B, S, H)
    assert out.dtype == x.dtype
    assert jnp.allclose(out, ref, atol=2e-3, rtol=2e-3), float(
        jnp.max(jnp.abs(out - ref))
    )

    print("KERNEL_OK")
</pallas_src>

<mosaic_0001>
module attributes {stable_mosaic.version = 11 : i64} {
  func.func @_linear_resident_kernel(%arg0: i32, %arg1: memref<16x128xf32, #tpu.memory_space<vmem>>, %arg2: memref<128x128xbf16, #tpu.memory_space<vmem>>, %arg3: memref<1x128xf32, #tpu.memory_space<vmem>>, %arg4: memref<16x128xf32, #tpu.memory_space<vmem>>) attributes {dimension_semantics = [#tpu.dimension_semantics<parallel>], iteration_bounds = array<i64: 1>, scalar_prefetch = 0 : i64, scratch_operands = 0 : i64, tpu.core_type = #tpu.core_type<tc>, window_params = [{transform_indices = @transform_0, window_bounds = array<i64: 16, 128>}, {pipeline_mode = #tpu.pipeline_mode<synchronous>, transform_indices = @transform_1, window_bounds = array<i64: 128, 128>}, {pipeline_mode = #tpu.pipeline_mode<synchronous>, transform_indices = @transform_2, window_bounds = array<i64: 1, 128>}, {transform_indices = @transform_3, window_bounds = array<i64: 16, 128>}]} {
    %c0 = arith.constant 0 : index
    %c0_0 = arith.constant 0 : index
    %0 = vector.load %arg1[%c0, %c0_0] : memref<16x128xf32, #tpu.memory_space<vmem>>, vector<16x128xf32>
    %1 = arith.truncf %0 : vector<16x128xf32> to vector<16x128xbf16>
    %c0_1 = arith.constant 0 : index
    %c0_2 = arith.constant 0 : index
    %2 = vector.load %arg2[%c0_1, %c0_2] : memref<128x128xbf16, #tpu.memory_space<vmem>>, vector<128x128xbf16>
    %cst = arith.constant dense<0.000000e+00> : vector<16x128xf32>
    %3 = tpu.matmul %1, %2, %cst {dimension_numbers = #tpu.dot_dimension_numbers<[1], [0], [0], [1], [0, 0, 1, 1], [], []>} : vector<16x128xbf16>, vector<128x128xbf16>, vector<16x128xf32> -> vector<16x128xf32>
    %c0_3 = arith.constant 0 : index
    %c0_4 = arith.constant 0 : index
    %4 = vector.load %arg3[%c0_3, %c0_4] : memref<1x128xf32, #tpu.memory_space<vmem>>, vector<1x128xf32>
    %5 = vector.broadcast %4 : vector<1x128xf32> to vector<16x128xf32>
    %6 = arith.addf %3, %5 : vector<16x128xf32>
    %c0_5 = arith.constant 0 : index
    %c0_6 = arith.constant 0 : index
    %7 = vector.load %arg4[%c0_5, %c0_6] : memref<16x128xf32, #tpu.memory_space<vmem>>, vector<16x128xf32>
    tpu.vector_store %arg4[%c0_5, %c0_6], %6 {strides = array<i32>} : memref<16x128xf32, #tpu.memory_space<vmem>>, vector<16x128xf32>,
    return
  }
  func.func @transform_0(%arg0: i32) -> (i32, i32) {
    %c0_i32 = arith.constant 0 : i32
    %c0_i32_0 = arith.constant 0 : i32
    return %arg0, %c0_i32 : i32, i32
  }
  func.func @transform_1(%arg0: i32) -> (i32, i32) {
    %c0_i32 = arith.constant 0 : i32
    %c0_i32_0 = arith.constant 0 : i32
    %c0_i32_1 = arith.constant 0 : i32
    return %c0_i32, %c0_i32_0 : i32, i32
  }
  func.func @transform_2(%arg0: i32) -> (i32, i32) {
    %c0_i32 = arith.constant 0 : i32
    %c0_i32_0 = arith.constant 0 : i32
    %c0_i32_1 = arith.constant 0 : i32
    return %c0_i32, %c0_i32_0 : i32, i32
  }
  func.func @transform_3(%arg0: i32) -> (i32, i32) {
    %c0_i32 = arith.constant 0 : i32
    %c0_i32_0 = arith.constant 0 : i32
    return %arg0, %c0_i32 : i32, i32
  }
}

</mosaic_0001>

<bundles_post_ra>
// kernel: tpu_custom_call.1
= control target key start
LH: loop header
LB: loop body
LE: loop exit
PB: predicated region body
PF: predicated region fallthrough
CT: control target
= control target key end

     0   :  { %8 = vsyncpa [#allocation3], 0  ;;  %s380_s0 = inlined_call_operand.hbm [shape: f32[16,128], index: 0, kind: input, shape index: {}]   ;;  %s381_s1 = inlined_call_operand.hbm [shape: bf16[128,128], index: 1, kind: input, shape index: {}]   ;;  %s382_s2 = inlined_call_operand.vmem [shape: f32[1,128], index: 2, kind: input, shape index: {}]   ;;  %s383_s3 = inlined_call_operand.hbm [shape: f32[16,128], index: 3, kind: output, shape index: {}]  }
   0x1   :  { %9 = vsyncpa [#allocation6], 0 }
   0x2   :  { %10 = vsyncpa [#allocation4], 0  ;;  %s306_s12 = smov [#allocation2]   ;;  %s234_s16 = scalar_lea.hbm %s380_s0, 256 }
   0x3   :  { %s16_s13 = sshll.u32 %s306_s12, 4  ;;  %p235_p0 = scmp.ne.s32.totalorder %s380_s0, %s234_s16  ;;  %s17_s13 = int_to_ptr.vmem [resolvable:$true] %s16_s13 }
   0x4   :  { %p238_p1 = scmp.lt.u32.totalorder %s234_s16, %s380_s0 }
   0x6   :  { %p240_p2 = pnand %p238_p1, %p235_p0 }
   0x8   :  { %243 = shalt.err (!%p240_p2)
}
   0x9   :  { %s244_s21 = scalar_lea.vmem %s17_s13, 256  ;;  %p249_p4 = scmp.lt.s32.totalorder %s17_s13, %s17_s13 }
   0xa   :  { %p245_p3 = scmp.ne.s32.totalorder %s17_s13, %s244_s21  ;;  %p250_p5 = scmp.lt.s32.totalorder %s244_s21, %s244_s21 }
   0xc   :  { %p251_p6 = por %p250_p5, %p249_p4 }
   0xe   :  { %p252_p7 = pnand %p251_p6, %p245_p3 }
  0x10   :  { %255 = shalt.err (!%p252_p7)
}
  0x11   :  { %s307_s22 = smov 128   ;;  %s308_s23 = smov 8  }
  0x12   :  { %22 = dma.hbm_to_vmem [thread:$0]  %s380_s0, 256, %s17_s13, [#allocation3], %s307_s22, %s307_s22, %s308_s23  }
  0x13   :  { %s309_s26 = smov [#allocation5]   ;;  %s256_s30 = scalar_lea.hbm %s381_s1, 1024 }
  0x14   :  { %s28_s27 = sshll.u32 %s309_s26, 4  ;;  %p257_p8 = scmp.ne.s32.totalorder %s381_s1, %s256_s30  ;;  %s29_s27 = int_to_ptr.vmem [resolvable:$true] %s28_s27 }
  0x15   :  { %p260_p9 = scmp.lt.u32.totalorder %s256_s30, %s381_s1 }
  0x17   :  { %p262_p10 = pnand %p260_p9, %p257_p8 }
  0x19   :  { %265 = shalt.err (!%p262_p10)
}
  0x1a   :  { %s266_s8 = scalar_lea.vmem %s29_s27, 1024  ;;  %p271_p12 = scmp.lt.s32.totalorder %s29_s27, %s29_s27 }
  0x1b   :  { %p267_p11 = scmp.ne.s32.totalorder %s29_s27, %s266_s8  ;;  %p272_p13 = scmp.lt.s32.totalorder %s266_s8, %s266_s8 }
  0x1d   :  { %p273_p0 = por %p272_p13, %p271_p12 }
  0x1f   :  { %p274_p1 = pnand %p273_p0, %p267_p11 }
  0x21   :  { %277 = shalt.err (!%p274_p1)
}
  0x22   :  { %s310_s0 = smov 64   ;;  %s311_s9 = smov 4  }
  0x23   :  { %34 = dma.hbm_to_vmem [thread:$0]  %s381_s1, 1024, %s29_s27, [#allocation6], %s310_s0, %s310_s0, %s311_s9  }
  0x24   :  { %300 = dma.done.wait [#allocation3], 256  }
  0x25   :  { %301 = vsyncadd [#allocation3], 4294967040 }
  0x26   :  { %302 = dma.done.wait [#allocation6], 1024  }
  0x27   :  { %303 = vsyncadd [#allocation6], 4294966272  ;;  %v312_v0 = vmov 0.0   ;;  %vm313_vm0 = vmmov 0   ;;  %v226_v1 = vld [vmem:[#allocation5] sm:$0xff]   ;;  %v227_v2 = vld [vmem:[#allocation5 + $0x8] sm:$0xff]  }
  0x28   :  { %197 = vmatprep.subr.bf16.mxu0 %v312_v0  ;;  %213 = vmatprep.mubr.msk.bf16.mxu0 %vm313_vm0, %v312_v0  ;;  %v228_v3 = vld [vmem:[#allocation5 + $0x10] sm:$0xff]   ;;  %v229_v4 = vld [vmem:[#allocation5 + $0x18] sm:$0xff]   ;;  %v230_v5 = vld [vmem:[#allocation5 + $0x20] sm:$0xff]   ;;  %s314_s13 = smov [#allocation7]  }
  0x29   :  { %198 = vmatpush3.bf16.msra.mxu0 %v226_v1  ;;  %v231_v6 = vld [vmem:[#allocation5 + $0x28] sm:$0xff]   ;;  %v232_v7 = vld [vmem:[#allocation5 + $0x30] sm:$0xff]   ;;  %v233_v8 = vld [vmem:[#allocation5 + $0x38] sm:$0xff]   ;;  %s166_s14 = sshll.u32 %s314_s13, 4  ;;  %s167_s14 = int_to_ptr.vmem [resolvable:$true] %s166_s14 }
  0x2a   :  { %199 = vmatprep.subr.bf16.mxu0 %v312_v0  ;;  %v44_v9 = vld [vmem:[#allocation2] sm:$0xff]  ;;  %v45_v10 = vld [vmem:[#allocation2 + $0x8] sm:$0xff]  ;;  %s278_s15 = scalar_lea.vmem %s167_s14, 256  ;;  %p283_p3 = scmp.lt.s32.totalorder %s167_s14, %s167_s14 }
  0x2b   :  { %v46_v11 = vpack.c.bf16 %v45_v10, %v44_v9  ;;  %v179_v12 = vld [vmem:[%s382_s2] ss:$0 sm:$0xff]  ;;  %p279_p2 = scmp.ne.s32.totalorder %s167_s14, %s278_s15  ;;  %p284_p4 = scmp.lt.s32.totalorder %s278_s15, %s278_s15 }
  0x2d   :  { %200 = vmatpush3.bf16.msra.mxu0 %v227_v2  ;;  %p285_p5 = por %p284_p4, %p283_p3 }
  0x2e   :  { %201 = vmatprep.subr.bf16.mxu0 %v312_v0 }
  0x2f   :  { %p286_p6 = pnand %p285_p5, %p279_p2 }
  0x31   :  { %202 = vmatpush3.bf16.msra.mxu0 %v228_v3 }
  0x32   :  { %203 = vmatprep.subr.bf16.mxu0 %v312_v0 }
  0x35   :  { %204 = vmatpush3.bf16.msra.mxu0 %v229_v4 }
  0x36   :  { %205 = vmatprep.subr.bf16.mxu0 %v312_v0 }
  0x39   :  { %206 = vmatpush3.bf16.msra.mxu0 %v230_v5 }
  0x3a   :  { %207 = vmatprep.subr.bf16.mxu0 %v312_v0 }
  0x3d   :  { %208 = vmatpush3.bf16.msra.mxu0 %v231_v6 }
  0x3e   :  { %209 = vmatprep.subr.bf16.mxu0 %v312_v0 }
  0x41   :  { %210 = vmatpush3.bf16.msra.mxu0 %v232_v7 }
  0x42   :  { %211 = vmatprep.subr.bf16.mxu0 %v312_v0 }
  0x45   :  { %212 = vmatpush3.bf16.msra.mxu0 %v233_v8 }
  0x48   :  { %214 = vmatmul.mubr.bf16.vlgmr.msra.gmra.mrb[0].mxu0 %v46_v11 }
 0x11b   :  { %v152_v13 = vpop.f32.mrb[0].mxu0 }
 0x11c   :  { %v153_v14 = vadd.f32 %v179_v12, %v152_v13  ;;  %v215_v15 = vpop.f32.mrb[1].mxu0 }
 0x11d   :  { %v155_v16 = vpop.f32.mrb[2].mxu0 }
 0x11e   :  { %159 = vst [vmem:[#allocation7] sm:$0xff] %v153_v14  ;;  %v156_v17 = vadd.f32 %v179_v12, %v155_v16  ;;  %v216_v18 = vpop.f32.mrb[3].mxu0 }
 0x120   :  { %160 = vst [vmem:[#allocation7 + $0x8] sm:$0xff] %v156_v17 }
 0x121   :  { %289 = shalt.err (!%p286_p6)
}
 0x122   :  { %s290_s17 = scalar_lea.hbm %s383_s3, 256 }
 0x123   :  { %p291_p7 = scmp.ne.s32.totalorder %s383_s3, %s290_s17  ;;  %p294_p8 = scmp.lt.u32.totalorder %s290_s17, %s383_s3 }
 0x125   :  { %p296_p9 = pnand %p294_p8, %p291_p7 }
 0x127   :  { %299 = shalt.err (!%p296_p9)
}
 0x128   :  { %172 = dma.vmem_to_hbm [thread:$0]  %s167_s14, 256, %s383_s3, [#allocation4], %s307_s22, %s307_s22, %s308_s23  }
 0x129   :  { %304 = dma.done.wait [#allocation4], 256  }
 0x12a   :  { %305 = vsyncadd [#allocation4], 4294967040 }
 0x12b   :  { %176 = vsyncpa [#allocation3], 1 }
 0x12c   :  { %177 = vsyncpa [#allocation6], 1 }
 0x12d   :  { %178 = vsyncpa [#allocation4], 1 }

</bundles_post_ra>
